<compile_context>
chip_gen: v7x
topology: tpu7x:2x2x1
jax: 0.10.0
libtpu: 0.0.40
codegen_flags: <defaults>
</compile_context>

<pallas_src>
import functools

import jax
import jax.numpy as jnp
from jax.experimental import pallas as pl
from jax.experimental.pallas import tpu as pltpu


# ---------------------------------------------------------------------------
# helpers
# ---------------------------------------------------------------------------
def _round_up(x: int, m: int) -> int:
    return (x + m - 1) // m * m


def _choose_tile_m(m: int) -> int:
    """Row-tile heuristic: multiples of 16 (full bf16 sublane packing); one fat
    tile for small M (grid steps are sequential per TensorCore); 512-row tiles
    for large M (>=2 steps feed both v7x cores via the 'parallel' axis)."""
    m16 = _round_up(max(m, 1), 16)
    return m16 if m16 <= 512 else 512


@functools.lru_cache(maxsize=None)
def _single_buffer_supported() -> bool:
    """Feature-probe pipeline_mode=pl.Buffered(1) on a top-level BlockSpec
    (single-buffers grid-invariant operands).  Any rejection -> fall back to the
    default double-buffered pipeline; the probe also checks numerics."""
    if not hasattr(pl, "Buffered"):
        return False
    try:
        def k(x_ref, w_ref, o_ref):
            o_ref[...] = x_ref[...] + w_ref[...]

        x = jnp.ones((16, 128), jnp.float32)
        w = jnp.full((8, 128), 2.0, jnp.float32)
        f = pl.pallas_call(
            k,
            out_shape=jax.ShapeDtypeStruct((16, 128), jnp.float32),
            grid=(2,),
            in_specs=[
                pl.BlockSpec((8, 128), lambda i: (i, 0)),
                pl.BlockSpec((8, 128), lambda i: (0, 0),
                             pipeline_mode=pl.Buffered(buffer_count=1)),
            ],
            out_specs=pl.BlockSpec((8, 128), lambda i: (i, 0)),
        )
        return bool(jnp.all(jax.block_until_ready(f(x, w)) == 3.0))
    except Exception:   # noqa: BLE001 — unsupported on this JAX version
        return False


def _vmem_limit_bytes(est_bytes: int) -> int:
    """Derive an explicit VMEM budget from the real chip capacity with headroom."""
    try:
        phys = int(pltpu.get_tpu_info().vmem_capacity_bytes)
    except Exception:                       # noqa: BLE001
        phys = 64 << 20                     # conservative: smallest per-TC VMEM (v7x)
    ceiling = (phys * 4) // 5               # ~20% headroom for compiler scratch
    want = est_bytes + (8 << 20)            # slack: semaphores, out double-buffer
    floor = min(32 << 20, ceiling)          # v5e default scoped limit is only 16 MiB
    return int(min(max(want, floor), ceiling))


def _estimate_vmem_bytes(tile_m, in_dim, out_dim, weights, biases,
                         compute_dtype, weight_bufs):
    cbytes = jnp.dtype(compute_dtype).itemsize
    est = 2 * tile_m * in_dim * cbytes                      # streamed x tile (dbl-buf)
    est += 2 * tile_m * out_dim * 4                         # output tile (dbl-buf)
    est += weight_bufs * sum(w.size * w.dtype.itemsize + b.size * b.dtype.itemsize
                             for w, b in zip(weights, biases))
    max_d = max(w.shape[1] for w in weights)
    est += 2 * tile_m * max_d * 4                           # live f32 intermediates
    return int(est)


# ---------------------------------------------------------------------------
# fused kernel: whole MLP on one (tile_m, in_dim) row tile
# ---------------------------------------------------------------------------
def _fused_mlp_kernel(*refs, num_layers, out_dim, compute_dtype):
    x_ref = refs[0]
    o_ref = refs[1 + 2 * num_layers]

    act = x_ref[...]                              # (tile_m, in_dim), compute dtype
    for layer in range(num_layers):
        w_ref = refs[1 + 2 * layer]               # (k, n_pad), compute dtype
        b_ref = refs[2 + 2 * layer]               # (1, n_pad), f32
        acc = jnp.dot(act, w_ref[...], preferred_element_type=jnp.float32)
        acc = acc + b_ref[...]                    # bias add in f32
        if layer < num_layers - 1:
            act = jnp.maximum(acc, 0.0).astype(compute_dtype)  # ReLU, re-pack for MXU
        else:
            act = acc                             # final layer stays f32
    # Padded columns / masked edge rows never reach HBM: the out block's last dim
    # is the true out_dim and ragged rows are masked by the pipeline on store.
    o_ref[...] = act[:, :out_dim].astype(o_ref.dtype)


# ---------------------------------------------------------------------------
# parameter init / packing
# ---------------------------------------------------------------------------
def init_mccd_mlp_params(key, input_dim, dimensions, dtype=jnp.float32):
    """nn.Linear default init: W, b ~ U(-1/sqrt(in_dim), 1/sqrt(in_dim)); W is (out, in)."""
    dims_in = [input_dim] + list(dimensions[:-1])
    dims_out = list(dimensions)
    params = []
    for in_d, out_d in zip(dims_in, dims_out):
        key, kw, kb = jax.random.split(key, 3)
        bound = 1.0 / jnp.sqrt(jnp.asarray(in_d, dtype))
        w = jax.random.uniform(kw, (out_d, in_d), dtype, -bound, bound)
        b = jax.random.uniform(kb, (out_d,), dtype, -bound, bound)
        params.append((w, b))
    return params


def pack_mccd_mlp_params(params, compute_dtype=jnp.bfloat16):
    """One-time prep: transpose to (in, out), zero-pad every OUTPUT dim (and the
    matching next-layer input dim) to a multiple of 128 for lane-dense MXU
    operands, and cast weights to the matmul dtype.  Layer 0 keeps its true
    input dim, so x never needs feature padding.  Zero-padded weight rows/cols
    are mathematically inert for the valid output columns."""
    in_dim = params[0][0].shape[1]
    out_dim = params[-1][0].shape[0]
    weights, biases = [], []
    k_pad = in_dim                                   # layer 0: K = true input dim
    for w, b in params:
        o, i = w.shape
        n_pad = _round_up(o, 128)
        w_t = jnp.pad(jnp.transpose(w), ((0, k_pad - i), (0, n_pad - o)))
        weights.append(w_t.astype(compute_dtype))
        biases.append(jnp.pad(b, (0, n_pad - o)).astype(jnp.float32).reshape(1, n_pad))
        k_pad = n_pad                                # next layer's K = padded output
    return {"weights": weights, "biases": biases, "in_dim": in_dim,
            "out_dim": out_dim, "compute_dtype": jnp.dtype(compute_dtype)}


# ---------------------------------------------------------------------------
# forward
# ---------------------------------------------------------------------------
def mccd_mlp_forward(x, packed, training=False, dropout=0.1):
    """Eval-mode forward of MCCD_MLP (dropout == identity).

    x: (..., in_dim) — leading dims are flattened like nn.Linear and restored.
    """
    if training and dropout > 0.0:
        # TODO(synk): training-mode dropout needs pltpu.prng_seed /
        # pltpu.prng_random_bits inside the kernel; only eval-mode is implemented.
        raise NotImplementedError(
            "MCCD_MLP Pallas kernel implements eval-mode forward only.")

    weights, biases = packed["weights"], packed["biases"]
    in_dim, out_dim = packed["in_dim"], packed["out_dim"]
    compute_dtype = packed["compute_dtype"]
    num_layers = len(weights)

    assert x.shape[-1] == in_dim
    lead = x.shape[:-1]
    out_dtype = x.dtype
    x2 = x.reshape(-1, in_dim)
    if x2.dtype != compute_dtype:
        x2 = x2.astype(compute_dtype)     # stream x tiles already in the matmul dtype
    M = x2.shape[0]

    tile_m = _choose_tile_m(M)
    grid = (pl.cdiv(M, tile_m),)          # ragged last block: OOB rows masked on store

    single_buf = _single_buffer_supported()

    def _const_spec(shape):               # grid-invariant operands (weights / biases)
        if single_buf:
            return pl.BlockSpec(shape, lambda i: (0, 0),
                                pipeline_mode=pl.Buffered(buffer_count=1))
        return pl.BlockSpec(shape, lambda i: (0, 0))

    in_specs = [pl.BlockSpec((tile_m, in_dim), lambda i: (i, 0))]
    operands = [x2]
    for w, b in zip(weights, biases):
        in_specs += [_const_spec(w.shape), _const_spec(b.shape)]
        operands += [w, b]

    est = _estimate_vmem_bytes(tile_m, in_dim, out_dim, weights, biases,
                               compute_dtype, weight_bufs=1 if single_buf else 2)

    kernel = functools.partial(_fused_mlp_kernel, num_layers=num_layers,
                               out_dim=out_dim, compute_dtype=compute_dtype)

    # TODO(synk): layer stacks too large to stay VMEM-resident would need an inner
    # K/N pipeline (pltpu.emit_pipeline) with a pl.when-initialized accumulator.
    out = pl.pallas_call(
        kernel,
        out_shape=jax.ShapeDtypeStruct((M, out_dim), out_dtype),
        grid_spec=pl.GridSpec(
            grid=grid,
            in_specs=in_specs,
            out_specs=pl.BlockSpec((tile_m, out_dim), lambda i: (i, 0)),
        ),
        compiler_params=pltpu.CompilerParams(
            dimension_semantics=("parallel",),
            vmem_limit_bytes=_vmem_limit_bytes(est),
        ),
    )(*operands)

    return out.reshape(*lead, out_dim)


# ---------------------------------------------------------------------------
# reference + test
# ---------------------------------------------------------------------------
def _reference_forward(x, params):
    num_layers = len(params)
    for i, (w, b) in enumerate(params):
        x = x @ w.T + b
        if i < num_layers - 1:
            x = jnp.maximum(x, 0.0)
    return x


if __name__ == "__main__":
    key = jax.random.PRNGKey(0)
    kx, kp, kx2 = jax.random.split(key, 3)

    batch = 16
    input_dim = 32
    dimensions = [64, 32, 16]

    x = jax.random.normal(kx, (batch, input_dim), dtype=jnp.float32)
    params = init_mccd_mlp_params(kp, input_dim, dimensions)
    ref = _reference_forward(x, params)

    # f32 compute path: matches eval-mode nn.Linear semantics.
    packed_f32 = pack_mccd_mlp_params(params, compute_dtype=jnp.float32)
    out = jax.block_until_ready(mccd_mlp_forward(x, packed_f32))
    assert out.shape == (batch, dimensions[-1])
    assert jnp.allclose(out, ref, atol=1e-5, rtol=1e-5)

    # Default bf16 matmul path (native MXU rate, f32 accumulation).
    packed_bf16 = pack_mccd_mlp_params(params)            # compute_dtype=bf16 default
    out_bf16 = jax.block_until_ready(mccd_mlp_forward(x, packed_bf16))
    assert out_bf16.dtype == x.dtype
    assert jnp.allclose(out_bf16, ref, atol=5e-2, rtol=5e-2)

    # Ragged 3-D input exercises the masked last row-block + leading-dim flattening.
    x3 = jax.random.normal(kx2, (2, 5, input_dim), dtype=jnp.float32)
    out3 = jax.block_until_ready(mccd_mlp_forward(x3, packed_f32))
    ref3 = _reference_forward(x3.reshape(-1, input_dim), params).reshape(2, 5, -1)
    assert out3.shape == (2, 5, dimensions[-1])
    assert jnp.allclose(out3, ref3, atol=1e-5, rtol=1e-5)

    print("KERNEL_OK")
</pallas_src>

<mosaic_0001>
module attributes {stable_mosaic.version = 11 : i64} {
  func.func @k(%arg0: i32, %arg1: memref<8x128xf32, #tpu.memory_space<vmem>>, %arg2: memref<8x128xf32, #tpu.memory_space<vmem>>, %arg3: memref<8x128xf32, #tpu.memory_space<vmem>>) attributes {dimension_semantics = [#tpu.dimension_semantics<arbitrary>], iteration_bounds = array<i64: 2>, scalar_prefetch = 0 : i64, scratch_operands = 0 : i64, tpu.core_type = #tpu.core_type<tc>, window_params = [{transform_indices = @transform_0, window_bounds = array<i64: 8, 128>}, {pipeline_mode = #tpu.pipeline_mode<synchronous>, transform_indices = @transform_1, window_bounds = array<i64: 8, 128>}, {transform_indices = @transform_2, window_bounds = array<i64: 8, 128>}]} {
    %c0 = arith.constant 0 : index
    %c0_0 = arith.constant 0 : index
    %0 = vector.load %arg1[%c0, %c0_0] : memref<8x128xf32, #tpu.memory_space<vmem>>, vector<8x128xf32>
    %c0_1 = arith.constant 0 : index
    %c0_2 = arith.constant 0 : index
    %1 = vector.load %arg2[%c0_1, %c0_2] : memref<8x128xf32, #tpu.memory_space<vmem>>, vector<8x128xf32>
    %2 = arith.addf %0, %1 : vector<8x128xf32>
    %c0_3 = arith.constant 0 : index
    %c0_4 = arith.constant 0 : index
    %3 = vector.load %arg3[%c0_3, %c0_4] : memref<8x128xf32, #tpu.memory_space<vmem>>, vector<8x128xf32>
    tpu.vector_store %arg3[%c0_3, %c0_4], %2 {strides = array<i32>} : memref<8x128xf32, #tpu.memory_space<vmem>>, vector<8x128xf32>,
    return
  }
  func.func @transform_0(%arg0: i32) -> (i32, i32) {
    %c0_i32 = arith.constant 0 : i32
    %c0_i32_0 = arith.constant 0 : i32
    return %arg0, %c0_i32 : i32, i32
  }
  func.func @transform_1(%arg0: i32) -> (i32, i32) {
    %c0_i32 = arith.constant 0 : i32
    %c0_i32_0 = arith.constant 0 : i32
    %c0_i32_1 = arith.constant 0 : i32
    return %c0_i32, %c0_i32_0 : i32, i32
  }
  func.func @transform_2(%arg0: i32) -> (i32, i32) {
    %c0_i32 = arith.constant 0 : i32
    %c0_i32_0 = arith.constant 0 : i32
    return %arg0, %c0_i32 : i32, i32
  }
}

module attributes {stable_mosaic.version = 11 : i64} {
  func.func @_fused_mlp_kernel(%arg0: i32, %arg1: memref<16x32xf32, #tpu.memory_space<vmem>>, %arg2: memref<32x128xf32, #tpu.memory_space<vmem>>, %arg3: memref<1x128xf32, #tpu.memory_space<vmem>>, %arg4: memref<128x128xf32, #tpu.memory_space<vmem>>, %arg5: memref<1x128xf32, #tpu.memory_space<vmem>>, %arg6: memref<128x128xf32, #tpu.memory_space<vmem>>, %arg7: memref<1x128xf32, #tpu.memory_space<vmem>>, %arg8: memref<16x16xf32, #tpu.memory_space<vmem>>) attributes {dimension_semantics = [#tpu.dimension_semantics<parallel>], iteration_bounds = array<i64: 1>, scalar_prefetch = 0 : i64, scratch_operands = 0 : i64, tpu.core_type = #tpu.core_type<tc>, window_params = [{transform_indices = @transform_0, window_bounds = array<i64: 16, 32>}, {pipeline_mode = #tpu.pipeline_mode<synchronous>, transform_indices = @transform_1, window_bounds = array<i64: 32, 128>}, {pipeline_mode = #tpu.pipeline_mode<synchronous>, transform_indices = @transform_2, window_bounds = array<i64: 1, 128>}, {pipeline_mode = #tpu.pipeline_mode<synchronous>, transform_indices = @transform_3, window_bounds = array<i64: 128, 128>}, {pipeline_mode = #tpu.pipeline_mode<synchronous>, transform_indices = @transform_4, window_bounds = array<i64: 1, 128>}, {pipeline_mode = #tpu.pipeline_mode<synchronous>, transform_indices = @transform_5, window_bounds = array<i64: 128, 128>}, {pipeline_mode = #tpu.pipeline_mode<synchronous>, transform_indices = @transform_6, window_bounds = array<i64: 1, 128>}, {transform_indices = @transform_7, window_bounds = array<i64: 16, 16>}]} {
    %c0 = arith.constant 0 : index
    %c0_0 = arith.constant 0 : index
    %0 = vector.load %arg1[%c0, %c0_0] : memref<16x32xf32, #tpu.memory_space<vmem>>, vector<16x32xf32>
    %c0_1 = arith.constant 0 : index
    %c0_2 = arith.constant 0 : index
    %1 = vector.load %arg2[%c0_1, %c0_2] : memref<32x128xf32, #tpu.memory_space<vmem>>, vector<32x128xf32>
    %cst = arith.constant dense<0.000000e+00> : vector<16x128xf32>
    %2 = tpu.matmul %0, %1, %cst {dimension_numbers = #tpu.dot_dimension_numbers<[1], [0], [0], [1], [0, 0, 1, 1], [], []>} : vector<16x32xf32>, vector<32x128xf32>, vector<16x128xf32> -> vector<16x128xf32>
    %c0_3 = arith.constant 0 : index
    %c0_4 = arith.constant 0 : index
    %3 = vector.load %arg3[%c0_3, %c0_4] : memref<1x128xf32, #tpu.memory_space<vmem>>, vector<1x128xf32>
    %4 = vector.broadcast %3 : vector<1x128xf32> to vector<16x128xf32>
    %5 = arith.addf %2, %4 : vector<16x128xf32>
    %cst_5 = arith.constant 0.000000e+00 : f32
    %6 = vector.broadcast %cst_5 : f32 to vector<16x128xf32>
    %7 = arith.maximumf %5, %6 : vector<16x128xf32>
    %c0_6 = arith.constant 0 : index
    %c0_7 = arith.constant 0 : index
    %8 = vector.load %arg4[%c0_6, %c0_7] : memref<128x128xf32, #tpu.memory_space<vmem>>, vector<128x128xf32>
    %cst_8 = arith.constant dense<0.000000e+00> : vector<16x128xf32>
    %9 = tpu.matmul %7, %8, %cst_8 {dimension_numbers = #tpu.dot_dimension_numbers<[1], [0], [0], [1], [0, 0, 1, 1], [], []>} : vector<16x128xf32>, vector<128x128xf32>, vector<16x128xf32> -> vector<16x128xf32>
    %c0_9 = arith.constant 0 : index
    %c0_10 = arith.constant 0 : index
    %10 = vector.load %arg5[%c0_9, %c0_10] : memref<1x128xf32, #tpu.memory_space<vmem>>, vector<1x128xf32>
    %11 = vector.broadcast %10 : vector<1x128xf32> to vector<16x128xf32>
    %12 = arith.addf %9, %11 : vector<16x128xf32>
    %cst_11 = arith.constant 0.000000e+00 : f32
    %13 = vector.broadcast %cst_11 : f32 to vector<16x128xf32>
    %14 = arith.maximumf %12, %13 : vector<16x128xf32>
    %c0_12 = arith.constant 0 : index
    %c0_13 = arith.constant 0 : index
    %15 = vector.load %arg6[%c0_12, %c0_13] : memref<128x128xf32, #tpu.memory_space<vmem>>, vector<128x128xf32>
    %cst_14 = arith.constant dense<0.000000e+00> : vector<16x128xf32>
    %16 = tpu.matmul %14, %15, %cst_14 {dimension_numbers = #tpu.dot_dimension_numbers<[1], [0], [0], [1], [0, 0, 1, 1], [], []>} : vector<16x128xf32>, vector<128x128xf32>, vector<16x128xf32> -> vector<16x128xf32>
    %c0_15 = arith.constant 0 : index
    %c0_16 = arith.constant 0 : index
    %17 = vector.load %arg7[%c0_15, %c0_16] : memref<1x128xf32, #tpu.memory_space<vmem>>, vector<1x128xf32>
    %18 = vector.broadcast %17 : vector<1x128xf32> to vector<16x128xf32>
    %19 = arith.addf %16, %18 : vector<16x128xf32>
    %20 = vector.extract_strided_slice %19 {offsets = [0, 0], sizes = [16, 16], strides = [1, 1]} : vector<16x128xf32> to vector<16x16xf32>
    %c0_17 = arith.constant 0 : index
    %c0_18 = arith.constant 0 : index
    %21 = vector.load %arg8[%c0_17, %c0_18] : memref<16x16xf32, #tpu.memory_space<vmem>>, vector<16x16xf32>
    tpu.vector_store %arg8[%c0_17, %c0_18], %20 {strides = array<i32>} : memref<16x16xf32, #tpu.memory_space<vmem>>, vector<16x16xf32>,
    return
  }
  func.func @transform_0(%arg0: i32) -> (i32, i32) {
    %c0_i32 = arith.constant 0 : i32
    %c0_i32_0 = arith.constant 0 : i32
    return %arg0, %c0_i32 : i32, i32
  }
  func.func @transform_1(%arg0: i32) -> (i32, i32) {
    %c0_i32 = arith.constant 0 : i32
    %c0_i32_0 = arith.constant 0 : i32
    %c0_i32_1 = arith.constant 0 : i32
    return %c0_i32, %c0_i32_0 : i32, i32
  }
  func.func @transform_2(%arg0: i32) -> (i32, i32) {
    %c0_i32 = arith.constant 0 : i32
    %c0_i32_0 = arith.constant 0 : i32
    %c0_i32_1 = arith.constant 0 : i32
    return %c0_i32, %c0_i32_0 : i32, i32
  }
  func.func @transform_3(%arg0: i32) -> (i32, i32) {
    %c0_i32 = arith.constant 0 : i32
    %c0_i32_0 = arith.constant 0 : i32
    %c0_i32_1 = arith.constant 0 : i32
    return %c0_i32, %c0_i32_0 : i32, i32
  }
  func.func @transform_4(%arg0: i32) -> (i32, i32) {
    %c0_i32 = arith.constant 0 : i32
    %c0_i32_0 = arith.constant 0 : i32
    %c0_i32_1 = arith.constant 0 : i32
    return %c0_i32, %c0_i32_0 : i32, i32
  }
  func.func @transform_5(%arg0: i32) -> (i32, i32) {
    %c0_i32 = arith.constant 0 : i32
    %c0_i32_0 = arith.constant 0 : i32
    %c0_i32_1 = arith.constant 0 : i32
    return %c0_i32, %c0_i32_0 : i32, i32
  }
  func.func @transform_6(%arg0: i32) -> (i32, i32) {
    %c0_i32 = arith.constant 0 : i32
    %c0_i32_0 = arith.constant 0 : i32
    %c0_i32_1 = arith.constant 0 : i32
    return %c0_i32, %c0_i32_0 : i32, i32
  }
  func.func @transform_7(%arg0: i32) -> (i32, i32) {
    %c0_i32 = arith.constant 0 : i32
    %c0_i32_0 = arith.constant 0 : i32
    return %arg0, %c0_i32 : i32, i32
  }
}

</mosaic_0001>

<bundles_post_ra>
// kernel: tpu_custom_call.1
= control target key start
LH: loop header
LB: loop body
LE: loop exit
PB: predicated region body
PF: predicated region fallthrough
CT: control target
= control target key end

     0   :  { %7 = vsyncpa [#allocation3], 0  ;;  %s690_s0 = inlined_call_operand.hbm [shape: f32[16,128], index: 0, kind: input, shape index: {}]   ;;  %s691_s1 = inlined_call_operand.hbm [shape: f32[8,128], index: 1, kind: input, shape index: {}]   ;;  %s692_s2 = inlined_call_operand.hbm [shape: f32[16,128], index: 2, kind: output, shape index: {}]  }
   0x1   :  { %9 = vsyncpa [#allocation3 + $0x1], 0 }
   0x2   :  { %10 = vsyncpa [#allocation6], 0 }
   0x3   :  { %11 = vsyncpa [#allocation4], 0 }
   0x4   :  { %13 = vsyncpa [#allocation4 + $0x1], 0  ;;  %s489_s9 = smov 0   ;;  %s491_s10 = smov 0  }
   0x5   :  { %s493_s11 = smov 0   ;;  %s495_s12 = smov 0  }
   0x6 LB: > { %s510_s13 = sadd.s32 4294967295, %s469_s12   ;;  %s270_s14 = sadd.s32 4294967294, %s469_s12   ;;  %s469_s12 = sphi %s495_s12, %s716_s12   ;;  %s465_s11 = sphi %s493_s11, %s715_s11   ;;  %s461_s10 = sphi %s491_s10, %s714_s10   ;;  %s457_s9 = sphi %s489_s9, %s713_s9  }
   0x7   : > { %p39_p0 = scmp.ne.s32.totalorder %s461_s10, %s457_s9  ;;  %p693_p1 = scmp.eq.s32.totalorder %s510_s13, 0 }
   0x8   : > { %p90_p3 = scmp.eq.s32.totalorder %s270_s14, 1  ;;  %p271_p5 = scmp.ge.s32.totalorder %s469_s12, 1 }
   0x9   : > { %p519_p4 = por %p693_p1, %p39_p0  ;;  %p97_p7 = scmp.lt.s32.totalorder %s469_s12, 3 }
   0xa   : > { %p524_p6 = por %p90_p3, %p39_p0  ;;  %s471_s18 = smov [#allocation5]  }
   0xb   : > { %s696_s15 = scalar_select %p519_p4, 1, 0 }
   0xc   : > { %s697_s16 = scalar_select %p524_p6, 1, 0 }
   0xd   : > { %p529_p8 = pnand %p271_p5, %p97_p7  ;;  %s110_s19 = sshll.u32 %s471_s18, 4  ;;  %s111_s19 = int_to_ptr.vmem [resolvable:$true] %s110_s19 }
   0xe   : > { %s537_s20 = sadd.s32 1, %s469_s12   ;;  %s26_s24 = sadd.s32 1, %s465_s11 }
   0xf   : > { %s698_s17 = scalar_select %p529_p8, 1, 0 }
  0x10   : > { %p292_p10 = pneg %p529_p8  ;;  %s23_s22 = ssub.s32 %s469_s12, %s537_s20 }
  0x11   : > { %p547_p12 = scmp.eq.s32.totalorder %s23_s22, 0  ;;  %s341_s27 = scalar_lea.hbm %s691_s1, 128 }
  0x12   : > { %p541_p11 = pnand %p292_p10, %p693_p1  ;;  %p342_p0 = scmp.ne.s32.totalorder %s691_s1, %s341_s27 }
  0x13   : > { %s700_s23 = scalar_select %p547_p12, 1, 0 }
  0x14   : > { %p343_p3 = pneg %p541_p11  ;;  %p348_p10 = scmp.lt.u32.totalorder %s341_s27, %s691_s1 }
  0x16   : > { %p344_p5 = pnand %p343_p3, %p342_p0 }
  0x18   : > { %p345_p7 = pneg %p344_p5 }
  0x1a   : > { %p350_p9 = pnand %p348_p10, %p345_p7 }
  0x1c   : > { %353 = shalt.err (!%p350_p9)
}
  0x1d   : > { %s354_s4 = scalar_lea.vmem %s111_s19, 128  ;;  %p362_p6 = scmp.lt.s32.totalorder %s111_s19, %s111_s19 }
  0x1e   : > { %p355_p1 = scmp.ne.s32.totalorder %s111_s19, %s354_s4  ;;  %p363_p4 = scmp.lt.s32.totalorder %s354_s4, %s354_s4 }
  0x20   : > { %p357_p2 = pnand %p355_p1, %p343_p3  ;;  %p364_p8 = por %p363_p4, %p362_p6 }
  0x22   : > { %p358_p13 = pneg %p357_p2 }
  0x24   : > { %p365_p12 = pnand %p364_p8, %p358_p13 }
  0x26   : > { %368 = shalt.err (!%p365_p12)
}
  0x27   : > { %295 = dma.hbm_to_vmem [thread:$0]  (!%p541_p11), %s691_s1, 128, %s111_s19, [#allocation6]  }
  0x28   : > { %p701_p1 = scmp.ne.s32.totalorder %s700_s23, 0  ;;  %p34_p2 = scmp.eq.s32.totalorder %s469_s12, 0 }
  0x29   : > { %p702_p4 = scmp.ne.s32.totalorder %s465_s11, %s461_s10  ;;  %p703_p6 = scmp.eq.s32.totalorder %s510_s13, 1 }
  0x2a   : > { %s573_s7 = scalar_select %p701_p1, %s465_s11, %s26_s24  }
  0x2b   : > { %p581_p8 = por %p703_p6, %p702_p4  ;;  %p305_p9 = scmp.lt.s32.totalorder %s469_s12, 2 }
  0x2c   : > { %s121_s14 = sand.u32 1, %s465_s11   ;;  %p705_p12 = pmov %p702_p4 }
  0x2d   : > { %s274_s18 = sshll.u32 %s121_s14, 3  ;;  %s275_s21 = sshll.u32 %s469_s12, 7 }
  0x2e   : > { %p35_p13 = por %p34_p2, %p705_p12  ;;  %s594_s19 = scalar_lea.hbm %s690_s0, %s275_s21 }
  0x2f   : > { %s125_s23 = scalar_lea.vmem [#allocation2], %s274_s18  ;;  %s122_s27 = scalar_lea.sflag [#allocation3], %s121_s14 }
  0x30   : > { %s132_s24 = sshll.u32 %s125_s23, 4  ;;  %p596_p11 = pnand %p305_p9, %p35_p13  ;;  %s600_s24 = int_to_ptr.vmem [resolvable:$true] %s132_s24 }
  0x31   : > { %s369_s28 = scalar_lea.hbm %s594_s19, 128  ;;  %s374_s3 = scalar_lea.hbm %s690_s0, 256 }
  0x32   : > { %p370_p0 = scmp.ne.s32.totalorder %s594_s19, %s369_s28  ;;  %p371_p3 = pneg %p596_p11 }
  0x33   : > { %p375_p10 = scmp.lt.u32.totalorder %s594_s19, %s690_s0  ;;  %p376_p1 = scmp.lt.u32.totalorder %s374_s3, %s369_s28 }
  0x34   : > { %p372_p5 = pnand %p371_p3, %p370_p0  ;;  %p378_p4 = scmp.lt.u32.totalorder %s369_s28, %s594_s19 }
  0x35   : > { %p377_p2 = por %p376_p1, %p375_p10 }
  0x36   : > { %p373_p7 = pneg %p372_p5 }
  0x37   : > { %p379_p6 = por %p378_p4, %p377_p2 }
  0x39   : > { %p380_p9 = pnand %p379_p6, %p373_p7 }
  0x3b   : > { %383 = shalt.err (!%p380_p9)
}
  0x3c   : > { %s384_s6 = scalar_lea.vmem %s600_s24, 128  ;;  %s472_s14 = smov [#allocation2]  }
  0x3d   : > { %p385_p12 = scmp.ne.s32.totalorder %s600_s24, %s384_s6  ;;  %s389_s18 = sshll.u32 %s472_s14, 4  ;;  %s390_s18 = int_to_ptr.vmem [resolvable:$false] %s389_s18 }
  0x3e   : > { %s391_s21 = scalar_lea.vmem %s390_s18, 256  ;;  %p392_p5 = scmp.lt.s32.totalorder %s600_s24, %s390_s18 }
  0x3f   : > { %p387_p13 = pnand %p385_p12, %p371_p3  ;;  %p393_p10 = scmp.lt.s32.totalorder %s391_s21, %s384_s6 }
  0x41   : > { %p388_p0 = pneg %p387_p13  ;;  %p394_p1 = por %p393_p10, %p392_p5 }
  0x43   : > { %p395_p2 = pnand %p394_p1, %p388_p0 }
  0x45   : > { %398 = shalt.err (!%p395_p2)
}
  0x46   : > { %299 = dma.hbm_to_vmem [thread:$0]  (!%p596_p11), %s594_s19, 128, %s600_s24, %s122_s27  }
  0x47   : > { %p707_p7 = scmp.ne.s32.totalorder %s698_s17, 0 }
  0x48   : > { %s630_s22 = sand.u32 (!%p707_p7), 1, %s461_s10   ;;  %p708_p3 = scmp.ne.s32.totalorder (!%p707_p7), %s696_s15, 0 }
  0x49   : > { %141 = sbr.rel (%p707_p7) target bundleno = 109 (0x6d), region = 28  ;;  %s277_s25 = sshll.u32 (!%p707_p7), %s630_s22, 3 }
  0x4a   : > { %s144_s23 = scalar_lea.sflag (!%p707_p7), [#allocation3], %s630_s22  ;;  %s147_s28 = scalar_lea.vmem (!%p707_p7), [#allocation2], %s277_s25 }
  0x50   : > { %444 = dma.done.wait (%p708_p3), %s144_s23, 128  }
  0x51   : > { %446 = vsyncadd (%p708_p3), %s144_s23, 4294967168  ;;  %p709_p4 = scmp.eq.s32.totalorder %s510_s13, 0 }
  0x53   : > { %448 = dma.done.wait (%p709_p4), [#allocation6], 128   ;;  %p710_p11 = pmov %p709_p4 }
  0x54   : > { %s171_s17 = scalar_lea.vmem [#allocation7], %s277_s25  ;;  %s281_s24 = sshll.u32 %s510_s13, 7  ;;  %v172_v0 = vld [vmem:[%s147_s28] sm:$0xff]  ;;  %v173_v1 = vld [vmem:[#allocation5] sm:$0xff] }
  0x55   : > { %450 = vsyncadd (%p710_p11), [#allocation6], 4294967168  ;;  %s190_s19 = sshll.u32 %s171_s17, 4  ;;  %v174_v2 = vadd.f32 %v173_v1, %v172_v0  ;;  %s648_s27 = scalar_lea.hbm %s692_s2, %s281_s24  ;;  %s643_s19 = int_to_ptr.vmem [resolvable:$true] %s190_s19 }
  0x56   : > { %s177_s29 = scalar_lea.sflag [#allocation4], %s630_s22  ;;  %s399_s30 = scalar_lea.vmem %s643_s19, 128 }
  0x57   : > { %175 = vst [vmem:[%s171_s17] sm:$0xff] %v174_v2  ;;  %p400_p6 = scmp.ne.s32.totalorder %s643_s19, %s399_s30  ;;  %s473_s13 = smov [#allocation7]  }
  0x58   : > { %s403_s3 = sshll.u32 %s473_s13, 4  ;;  %s404_s3 = int_to_ptr.vmem [resolvable:$false] %s403_s3 }
  0x59   : > { %p401_p9 = pnand %p400_p6, %p581_p8  ;;  %s405_s4 = scalar_lea.vmem %s404_s3, 256 }
  0x5a   : > { %p406_p13 = scmp.lt.s32.totalorder %s643_s19, %s404_s3  ;;  %p407_p0 = scmp.lt.s32.totalorder %s405_s4, %s399_s30 }
  0x5b   : > { %p402_p12 = pneg %p401_p9 }
  0x5c   : > { %p408_p5 = por %p407_p0, %p406_p13 }
  0x5e   : > { %p409_p10 = pnand %p408_p5, %p402_p12 }
  0x60   : > { %412 = shalt.err (!%p409_p10)
}
  0x61   : > { %s413_s5 = scalar_lea.hbm %s648_s27, 128  ;;  %s417_s18 = scalar_lea.hbm %s692_s2, 256 }
  0x62   : > { %p414_p1 = scmp.ne.s32.totalorder %s648_s27, %s413_s5  ;;  %p418_p3 = scmp.lt.u32.totalorder %s648_s27, %s692_s2 }
  0x63   : > { %p419_p4 = scmp.lt.u32.totalorder %s417_s18, %s413_s5  ;;  %p421_p6 = scmp.lt.u32.totalorder %s413_s5, %s648_s27 }
  0x64   : > { %p415_p2 = pnand %p414_p1, %p581_p8 }
  0x65   : > { %p420_p11 = por %p419_p4, %p418_p3 }
  0x66   : > { %p416_p7 = pneg %p415_p2 }
  0x67   : > { %p422_p9 = por %p421_p6, %p420_p11 }
  0x69   : > { %p423_p12 = pnand %p422_p9, %p416_p7 }
  0x6b   : > { %426 = shalt.err (!%p423_p12)
}
  0x6c   : > { %290 = dma.vmem_to_hbm [thread:$0]  (%p581_p8), %s643_s19, 128, %s648_s27, %s177_s29  }
  0x6d PF: > { %s202_s25 = sand.u32 1, %s457_s9   ;;  %p711_p13 = scmp.ne.s32.totalorder %s697_s16, 0 }
  0x6e   : > { %p712_p0 = scmp.ge.s32.totalorder %s469_s12, 2  ;;  %s203_s23 = scalar_lea.sflag [#allocation4], %s202_s25 }
  0x70   : > { %p301_p5 = pnand %p712_p0, %p711_p13 }
  0x72   : > { %452 = dma.done.wait (!%p301_p5), %s203_s23, 128  }
  0x73   : > { %454 = vsyncadd (!%p301_p5), %s203_s23, 4294967168  ;;  %p16_p10 = scmp.ge.s32.totalorder %s537_s20, 4   ;;  %s713_s9 = smov %s461_s10 }
  0x74   : > { %s714_s10 = smov %s465_s11  ;;  %s715_s11 = smov %s573_s7 }
  0x75   : > { %s716_s12 = smov %s537_s20  ;;  %18 = sbr.rel (!%p16_p10) target bundleno = 6 (0x6), region = 77 }
  0x7c   :  { %208 = vsyncpa [#allocation3], 1 }
  0x7d   :  { %210 = vsyncpa [#allocation3 + $0x1], 1 }
  0x7e   :  { %211 = vsyncpa [#allocation6], 1 }
  0x7f   :  { %212 = vsyncpa [#allocation4], 1 }
  0x80   :  { %214 = vsyncpa [#allocation4 + $0x1], 1 }

// kernel: tpu_custom_call.1
= control target key start
LH: loop header
LB: loop body
LE: loop exit
PB: predicated region body
PF: predicated region fallthrough
CT: control target
= control target key end

     0   :  { %12 = vsyncpa [#allocation3], 0  ;;  %s871_s0 = inlined_call_operand.hbm [shape: f32[16,32], index: 0, kind: input, shape index: {}]   ;;  %s872_s1 = inlined_call_operand.hbm [shape: f32[32,128], index: 1, kind: input, shape index: {}]   ;;  %s873_s2 = inlined_call_operand.vmem [shape: f32[1,128], index: 2, kind: input, shape index: {}]   ;;  %s874_s3 = inlined_call_operand.hbm [shape: f32[128,128], index: 3, kind: input, shape index: {}]   ;;  %s875_s4 = inlined_call_operand.vmem [shape: f32[1,128], index: 4, kind: input, shape index: {}]   ;;  %s876_s5 = inlined_call_operand.hbm [shape: f32[128,128], index: 5, kind: input, shape index: {}]   ;;  %s877_s6 = inlined_call_operand.vmem [shape: f32[1,128], index: 6, kind: input, shape index: {}]   ;;  %s878_s7 = inlined_call_operand.hbm [shape: f32[16,16], index: 7, kind: output, shape index: {}]  }
   0x1   :  { %13 = vsyncpa [#allocation6], 0 }
   0x2   :  { %14 = vsyncpa [#allocation9], 0 }
   0x3   :  { %15 = vsyncpa [#allocation4], 0  ;;  %s724_s24 = smov [#allocation5]   ;;  %s725_s26 = smov [#allocation2]  }
   0x4   :  { %s33_s25 = sshll.u32 %s724_s24, 4  ;;  %s21_s27 = sshll.u32 %s725_s26, 4  ;;  %s34_s25 = int_to_ptr.vmem [resolvable:$true] %s33_s25  ;;  %s771_s27 = int_to_ptr.vmem [resolvable:$true] %s21_s27 }
   0x5   :  { %s606_s30 = scalar_lea.hbm %s872_s1, 512 }
   0x6   :  { %p607_p0 = scmp.ne.s32.totalorder %s872_s1, %s606_s30  ;;  %p610_p1 = scmp.lt.u32.totalorder %s606_s30, %s872_s1 }
   0x8   :  { %p612_p2 = pnand %p610_p1, %p607_p0 }
   0xa   :  { %615 = shalt.err (!%p612_p2)
}
   0xb   :  { %s616_s12 = scalar_lea.vmem %s34_s25, 512  ;;  %p621_p4 = scmp.lt.s32.totalorder %s34_s25, %s34_s25 }
   0xc   :  { %p617_p3 = scmp.ne.s32.totalorder %s34_s25, %s616_s12  ;;  %p622_p5 = scmp.lt.s32.totalorder %s616_s12, %s616_s12 }
   0xe   :  { %p623_p6 = por %p622_p5, %p621_p4 }
  0x10   :  { %p624_p7 = pnand %p623_p6, %p617_p3 }
  0x12   :  { %627 = shalt.err (!%p624_p7)
}
  0x13   :  { %s726_s13 = smov 128   ;;  %s727_s14 = smov 8  }
  0x14   :  { %39 = dma.hbm_to_vmem [thread:$0]  %s872_s1, 512, %s34_s25, [#allocation6], %s726_s13, %s726_s13, %s727_s14  }
  0x15   :  { %s628_s19 = scalar_lea.hbm %s871_s0, 256 }
  0x16   :  { %p629_p8 = scmp.ne.s32.totalorder %s871_s0, %s628_s19  ;;  %p632_p9 = scmp.lt.u32.totalorder %s628_s19, %s871_s0 }
  0x18   :  { %p634_p10 = pnand %p632_p9, %p629_p8 }
  0x1a   :  { %637 = shalt.err (!%p634_p10)
}
  0x1b   :  { %s638_s24 = scalar_lea.vmem %s771_s27, 256  ;;  %p643_p12 = scmp.lt.s32.totalorder %s771_s27, %s771_s27 }
  0x1c   :  { %p639_p11 = scmp.ne.s32.totalorder %s771_s27, %s638_s24  ;;  %p644_p13 = scmp.lt.s32.totalorder %s638_s24, %s638_s24 }
  0x1e   :  { %p645_p0 = por %p644_p13, %p643_p12 }
  0x20   :  { %p646_p1 = pnand %p645_p0, %p639_p11 }
  0x22   :  { %649 = shalt.err (!%p646_p1)
}
  0x23   :  { %27 = dma.hbm_to_vmem [thread:$0]  %s871_s0, 256, %s771_s27, [#allocation3], %s726_s13, %s726_s13, %s727_s14  }
  0x24   :  { %s728_s26 = smov [#allocation7]   ;;  %s729_s29 = smov [#allocation8]  }
  0x25   :  { %s47_s28 = sshll.u32 %s728_s26, 4  ;;  %s61_s30 = sshll.u32 %s729_s29, 4  ;;  %s48_s28 = int_to_ptr.vmem [resolvable:$true] %s47_s28  ;;  %s808_s30 = int_to_ptr.vmem [resolvable:$true] %s61_s30 }
  0x26   :  { %s650_s10 = scalar_lea.hbm %s874_s3, 2048 }
  0x27   :  { %p651_p2 = scmp.ne.s32.totalorder %s874_s3, %s650_s10  ;;  %p654_p3 = scmp.lt.u32.totalorder %s650_s10, %s874_s3 }
  0x29   :  { %p656_p4 = pnand %p654_p3, %p651_p2 }
  0x2b   :  { %659 = shalt.err (!%p656_p4)
}
  0x2c   :  { %s660_s0 = scalar_lea.vmem %s48_s28, 2048  ;;  %p665_p6 = scmp.lt.s32.totalorder %s48_s28, %s48_s28 }
  0x2d   :  { %p661_p5 = scmp.ne.s32.totalorder %s48_s28, %s660_s0  ;;  %p666_p7 = scmp.lt.s32.totalorder %s660_s0, %s660_s0 }
  0x2f   :  { %p667_p8 = por %p666_p7, %p665_p6 }
  0x31   :  { %p668_p9 = pnand %p667_p8, %p661_p5 }
  0x33   :  { %671 = shalt.err (!%p668_p9)
}
  0x34   :  { %53 = dma.hbm_to_vmem [thread:$0]  %s874_s3, 2048, %s48_s28, [#allocation6], %s726_s13, %s726_s13, %s727_s14  }
  0x35   :  { %s672_s20 = scalar_lea.hbm %s876_s5, 2048 }
  0x36   :  { %p673_p10 = scmp.ne.s32.totalorder %s876_s5, %s672_s20  ;;  %p676_p11 = scmp.lt.u32.totalorder %s672_s20, %s876_s5 }
  0x38   :  { %p678_p12 = pnand %p676_p11, %p673_p10 }
  0x3a   :  { %681 = shalt.err (!%p678_p12)
}
  0x3b   :  { %s682_s1 = scalar_lea.vmem %s808_s30, 2048  ;;  %p687_p0 = scmp.lt.s32.totalorder %s808_s30, %s808_s30 }
  0x3c   :  { %p683_p13 = scmp.ne.s32.totalorder %s808_s30, %s682_s1  ;;  %p688_p1 = scmp.lt.s32.totalorder %s682_s1, %s682_s1 }
  0x3e   :  { %p689_p2 = por %p688_p1, %p687_p0 }
  0x40   :  { %p690_p3 = pnand %p689_p2, %p683_p13 }
  0x42   :  { %693 = shalt.err (!%p690_p3)
}
  0x43   :  { %67 = dma.hbm_to_vmem [thread:$0]  %s876_s5, 2048, %s808_s30, [#allocation9], %s726_s13, %s726_s13, %s727_s14  }
  0x44   :  { %716 = dma.done.wait [#allocation3], 256  }
  0x45   :  { %717 = vsyncadd [#allocation3], 4294967040 }
  0x46   :  { %718 = dma.done.wait [#allocation6], 2560  }
  0x47   :  { %719 = vsyncadd [#allocation6], 4294964736 }
  0x48   :  { %720 = dma.done.wait [#allocation9], 2048  }
  0x49   :  { %721 = vsyncadd [#allocation9], 4294965248  ;;  %vm95_vm0 = vcmask 261120   ;;  %v84_v0 = vld [vmem:[#allocation5] sm:$0xff]  ;;  %v85_v1 = vld [vmem:[#allocation5 + $0x8] sm:$0xff]  ;;  %s730_s8 = smov [#allocation10]  }
  0x4a   :  { %v86_v2 = vld [vmem:[#allocation5 + $0x10] sm:$0xff]  ;;  %v527_v3 = vpack.c.bf16 %v85_v1, %v84_v0  ;;  %v87_v4 = vld [vmem:[#allocation5 + $0x18] sm:$0xff]  ;;  %v179_v7 = vld [vmem:[#allocation7] sm:$0xff]  ;;  %s385_s9 = sshll.u32 %s730_s8, 4  ;;  %vm377_vm1 = vcmask 130048   ;;  %s386_s9 = int_to_ptr.vmem [resolvable:$true] %s385_s9 }
  0x4b   :  { %v82_v5 = vld [vmem:[#allocation2] sm:$0xff]  ;;  %v531_v6 = vpack.c.bf16 %v87_v4, %v86_v2  ;;  %v180_v8 = vld [vmem:[#allocation7 + $0x8] sm:$0xff]  ;;  %v182_v11 = vld [vmem:[#allocation7 + $0x18] sm:$0xff]  ;;  %p699_p5 = scmp.lt.s32.totalorder %s386_s9, %s386_s9 }
  0x4c   :  { %454 = vmatprep.mubr.msk.f32.mxu0 %vm95_vm0, %v82_v5  ;;  %v181_v9 = vld [vmem:[#allocation7 + $0x10] sm:$0xff]  ;;  %528 = vmatprep.subr.bf16.mxu0 %v527_v3  ;;  %v535_v10 = vpack.c.bf16 %v180_v8, %v179_v7  ;;  %v183_v13 = vld [vmem:[#allocation7 + $0x20] sm:$0xff]  ;;  %v184_v14 = vld [vmem:[#allocation7 + $0x28] sm:$0xff] }
  0x4d   :  { %530 = vmatpush3.bf16.msra.mxu0 %v527_v3  ;;  %v539_v12 = vpack.c.bf16 %v182_v11, %v181_v9  ;;  %v543_v15 = vpack.c.bf16 %v184_v14, %v183_v13  ;;  %v83_v16 = vld [vmem:[#allocation2 + $0x8] sm:$0xff]  ;;  %v185_v17 = vld [vmem:[#allocation7 + $0x30] sm:$0xff]  ;;  %v187_v20 = vld [vmem:[#allocation7 + $0x40] sm:$0xff] }
  0x4e   :  { %532 = vmatprep.subr.bf16.mxu0 %v531_v6  ;;  %536 = vmatprep.subr.bf16.mxu1 %v535_v10  ;;  %v186_v18 = vld [vmem:[#allocation7 + $0x38] sm:$0xff]  ;;  %v188_v21 = vld [vmem:[#allocation7 + $0x48] sm:$0xff]  ;;  %v189_v23 = vld [vmem:[#allocation7 + $0x50] sm:$0xff] }
  0x4f   :  { %538 = vmatpush3.bf16.msra.mxu1 %v535_v10  ;;  %v547_v19 = vpack.c.bf16 %v186_v18, %v185_v17  ;;  %v551_v22 = vpack.c.bf16 %v188_v21, %v187_v20  ;;  %v190_v24 = vld [vmem:[#allocation7 + $0x58] sm:$0xff]  ;;  %v191_v26 = vld [vmem:[#allocation7 + $0x60] sm:$0xff]  ;;  %v192_v27 = vld [vmem:[#allocation7 + $0x68] sm:$0xff] }
  0x50   :  { %540 = vmatprep.subr.bf16.mxu1 %v539_v12  ;;  %v555_v25 = vpack.c.bf16 %v190_v24, %v189_v23  ;;  %v559_v28 = vpack.c.bf16 %v192_v27, %v191_v26  ;;  %v193_v29 = vld [vmem:[#allocation7 + $0x70] sm:$0xff]  ;;  %v194_v30 = vld [vmem:[#allocation7 + $0x78] sm:$0xff]  ;;  %v279_v32 = vld [vmem:[#allocation8] sm:$0xff] }
  0x51   :  { %534 = vmatpush3.bf16.msra.mxu0 %v531_v6  ;;  %v563_v31 = vpack.c.bf16 %v194_v30, %v193_v29  ;;  %v280_v33 = vld [vmem:[#allocation8 + $0x8] sm:$0xff]  ;;  %v281_v34 = vld [vmem:[#allocation8 + $0x10] sm:$0xff]  ;;  %v282_v36 = vld [vmem:[#allocation8 + $0x18] sm:$0xff] }
  0x52   :  { %v567_v35 = vpack.c.bf16 %v280_v33, %v279_v32  ;;  %v571_v37 = vpack.c.bf16 %v282_v36, %v281_v34  ;;  %v283_v38 = vld [vmem:[#allocation8 + $0x20] sm:$0xff]  ;;  %v284_v39 = vld [vmem:[#allocation8 + $0x28] sm:$0xff]  ;;  %v285_v41 = vld [vmem:[#allocation8 + $0x30] sm:$0xff] }
  0x53   :  { %542 = vmatpush3.bf16.msra.mxu1 %v539_v12  ;;  %v575_v40 = vpack.c.bf16 %v284_v39, %v283_v38  ;;  %v286_v42 = vld [vmem:[#allocation8 + $0x38] sm:$0xff]  ;;  %v287_v44 = vld [vmem:[#allocation8 + $0x40] sm:$0xff]  ;;  %v288_v45 = vld [vmem:[#allocation8 + $0x48] sm:$0xff] }
  0x54   :  { %455 = vmatmul.mubr.msk.f32.vlgmr.msra.gmra.mrb[0].mxu0 %vm95_vm0, %v83_v16  ;;  %544 = vmatprep.subr.bf16.mxu1 %v543_v15  ;;  %v579_v43 = vpack.c.bf16 %v286_v42, %v285_v41  ;;  %v583_v46 = vpack.c.bf16 %v288_v45, %v287_v44  ;;  %v289_v47 = vld [vmem:[#allocation8 + $0x50] sm:$0xff]  ;;  %v290_v48 = vld [vmem:[#allocation8 + $0x58] sm:$0xff]  ;;  %v291_v50 = vld [vmem:[#allocation8 + $0x60] sm:$0xff] }
  0x55   :  { %568 = vmatprep.subr.bf16.mxu0 %v567_v35  ;;  %v587_v49 = vpack.c.bf16 %v290_v48, %v289_v47  ;;  %v292_v51 = vld [vmem:[#allocation8 + $0x68] sm:$0xff]  ;;  %v399_v53 = vld [vmem:[%s873_s2] ss:$0 sm:$0xff]  ;;  %v294_v61 = vld [vmem:[#allocation8 + $0x78] sm:$0xff] }
  0x56   :  { %570 = vmatpush3.bf16.msra.mxu0 %v567_v35  ;;  %v591_v52 = vpack.c.bf16 %v292_v51, %v291_v50  ;;  %v293_v60 = vld [vmem:[#allocation8 + $0x70] sm:$0xff] }
  0x57   :  { %546 = vmatpush3.bf16.msra.mxu1 %v543_v15  ;;  %572 = vmatprep.subr.bf16.mxu0 %v571_v37  ;;  %v595_v62 = vpack.c.bf16 %v294_v61, %v293_v60  ;;  %v402_v63 = vld [vmem:[%s875_s4] ss:$0 sm:$0xff]  ;;  %s694_s4 = scalar_lea.vmem %s386_s9, 256 }
  0x58   :  { %548 = vmatprep.subr.bf16.mxu1 %v547_v19  ;;  %v403_v6 = vld [vmem:[%s877_s6] ss:$0 sm:$0xff]  ;;  %p695_p4 = scmp.ne.s32.totalorder %s386_s9, %s694_s4  ;;  %p700_p6 = scmp.lt.s32.totalorder %s694_s4, %s694_s4 }
  0x5a   :  { %574 = vmatpush3.bf16.msra.mxu0 %v571_v37  ;;  %p701_p7 = por %p700_p6, %p699_p5 }
  0x5b   :  { %550 = vmatpush3.bf16.msra.mxu1 %v547_v19  ;;  %576 = vmatprep.subr.bf16.mxu0 %v575_v40 }
  0x5c   :  { %552 = vmatprep.subr.bf16.mxu1 %v551_v22  ;;  %p702_p8 = pnand %p701_p7, %p695_p4 }
  0x5e   :  { %578 = vmatpush3.bf16.msra.mxu0 %v575_v40 }
  0x5f   :  { %554 = vmatpush3.bf16.msra.mxu1 %v551_v22  ;;  %580 = vmatprep.subr.bf16.mxu0 %v579_v43 }
  0x60   :  { %556 = vmatprep.subr.bf16.mxu1 %v555_v25 }
  0x62   :  { %582 = vmatpush3.bf16.msra.mxu0 %v579_v43 }
  0x63   :  { %558 = vmatpush3.bf16.msra.mxu1 %v555_v25  ;;  %584 = vmatprep.subr.bf16.mxu0 %v583_v46 }
  0x64   :  { %560 = vmatprep.subr.bf16.mxu1 %v559_v28 }
  0x66   :  { %586 = vmatpush3.bf16.msra.mxu0 %v583_v46 }
  0x67   :  { %562 = vmatpush3.bf16.msra.mxu1 %v559_v28  ;;  %588 = vmatprep.subr.bf16.mxu0 %v587_v49 }
  0x68   :  { %564 = vmatprep.subr.bf16.mxu1 %v563_v31 }
  0x6a   :  { %590 = vmatpush3.bf16.msra.mxu0 %v587_v49 }
  0x6b   :  { %566 = vmatpush3.bf16.msra.mxu1 %v563_v31  ;;  %592 = vmatprep.subr.bf16.mxu0 %v591_v52 }
  0x6e   :  { %594 = vmatpush3.bf16.msra.mxu0 %v591_v52 }
  0x6f   :  { %596 = vmatprep.subr.bf16.mxu0 %v595_v62 }
  0x72   :  { %598 = vmatpush3.bf16.msra.mxu0 %v595_v62 }
 0x127   :  { %v456_v54 = vpop.f32.mrb[0].mxu0 }
 0x128   :  { %v174_v55 = vadd.f32 %v456_v54, %v399_v53  ;;  %v168_v56 = vpop.f32.mrb[1].mxu0 }
 0x129   :  { %v169_v57 = vadd.f32 %v399_v53, %v168_v56 }
 0x12a   :  { %v178_v59 = vmax.f32 %v174_v55, 0.0 }
 0x12b   :  { %v177_v58 = vmax.f32 %v169_v57, 0.0 }
 0x12d   :  { %489 = vmatprep.mubr.f32.mxu1 %v177_v58 }
 0x12e   :  { %490 = vmatmul.mubr.f32.vlgmr.msra.gmra.mrb[0].mxu1 %v178_v59 }
 0x201   :  { %v491_v0 = vpop.f32.mrb[0].mxu1 }
 0x202   :  { %v274_v1 = vadd.f32 %v491_v0, %v402_v63  ;;  %v268_v2 = vpop.f32.mrb[1].mxu1 }
 0x203   :  { %v269_v3 = vadd.f32 %v402_v63, %v268_v2 }
 0x204   :  { %v278_v5 = vmax.f32 %v274_v1, 0.0 }
 0x205   :  { %v277_v4 = vmax.f32 %v269_v3, 0.0 }
 0x207   :  { %524 = vmatprep.mubr.f32.mxu0 %v277_v4 }
 0x208   :  { %525 = vmatmul.mubr.f32.vlgmr.msra.gmra.mrb[2].mxu0 %v278_v5 }
 0x2db   :  { %v526_v7 = vpop.f32.mrb[2].mxu0 }
 0x2dc   :  { %v374_v8 = vadd.f32 %v526_v7, %v403_v6  ;;  %v368_v9 = vpop.f32.mrb[3].mxu0 }
 0x2dd   :  { %v369_v10 = vadd.f32 %v403_v6, %v368_v9 }
 0x2de   :  { %379 = vst.msk [vmem:[#allocation10 + $0x8] sm:$0xff] %vm377_vm1, %v374_v8 }
 0x2df   :  { %378 = vst.msk [vmem:[#allocation10] sm:$0xff] %vm377_vm1, %v369_v10 }
 0x2e0   :  { %705 = shalt.err (!%p702_p8)
}
 0x2e1   :  { %s706_s6 = scalar_lea.hbm %s878_s7, 256 }
 0x2e2   :  { %p707_p9 = scmp.ne.s32.totalorder %s878_s7, %s706_s6  ;;  %p710_p10 = scmp.lt.u32.totalorder %s706_s6, %s878_s7 }
 0x2e4   :  { %p712_p11 = pnand %p710_p10, %p707_p9 }
 0x2e6   :  { %715 = shalt.err (!%p712_p11)
}
 0x2e7   :  { %391 = dma.vmem_to_hbm [thread:$0]  %s386_s9, 256, %s878_s7, [#allocation4], %s726_s13, %s726_s13, %s727_s14  }
 0x2e8   :  { %722 = dma.done.wait [#allocation4], 256  }
 0x2e9   :  { %723 = vsyncadd [#allocation4], 4294967040 }
 0x2ea   :  { %395 = vsyncpa [#allocation3], 1 }
 0x2eb   :  { %396 = vsyncpa [#allocation6], 1 }
 0x2ec   :  { %397 = vsyncpa [#allocation9], 1 }
 0x2ed   :  { %398 = vsyncpa [#allocation4], 1 }

</bundles_post_ra>
